<compile_context>
chip_gen: v6e
topology: v6e:2x2x1
jax: 0.10.0
libtpu: 0.0.40
codegen_flags: <defaults>
</compile_context>

<pallas_src>
import functools

import jax
import jax.numpy as jnp
from jax.experimental import pallas as pl
from jax.experimental.pallas import tpu as pltpu

_LANE = 128      # lane width (last dim)
_SUBLANE = 8     # f32 sublane count (second-to-last dim)


def _round_up(x, m):
    return ((x + m - 1) // m) * m


# ----------------------------- Pallas kernel --------------------------------

def _mlp_fused_kernel(*refs, num_layers, n_class):
    # refs = (x_ref, w0_ref, b0_ref, w1_ref, b1_ref, ..., o_ref)
    # x:  (TM, Din_pad)   f32
    # wl: (K_pad, N_pad)  bf16, already transposed to (in, out) and zero-padded
    # bl: (1, N_pad)      f32, zero-padded
    # o:  (TM, Nclass_pad) f32 (lane-dense, unmasked stores)
    x_ref = refs[0]
    o_ref = refs[-1]
    wb_refs = refs[1:-1]

    h = x_ref[...]                                   # f32
    for l in range(num_layers):
        w = wb_refs[2 * l][...]                      # bf16
        b = wb_refs[2 * l + 1][...]                  # f32
        # bf16 x bf16 -> f32 accumulation on the MXU; epilogue in f32 on the VPU.
        h = jnp.dot(h.astype(jnp.bfloat16), w,
                    preferred_element_type=jnp.float32) + b
        if l < num_layers - 1:
            h = jnp.maximum(h, 0.0)    # ReLU; dropout = identity (inference)

    # log_softmax over the real n_class lanes only (mask the zero padding), in f32.
    lane = jax.lax.broadcasted_iota(jnp.int32, h.shape, 1)
    logits = jnp.where(lane < n_class, h, jnp.float32(-1e30))
    m = jnp.max(logits, axis=1, keepdims=True)
    shifted = logits - m
    lse = jnp.log(jnp.sum(jnp.exp(shifted), axis=1, keepdims=True))
    o_ref[...] = (shifted - lse).astype(o_ref.dtype)


# ------------------------------ JAX wrappers ---------------------------------

def prepare_params(params):
    """One-time weight prep: transpose to (D_in, D_out), cast to bf16, zero-pad to 128.

    Returns (ws_bf16, bs_f32, real_dims) where real_dims are the unpadded layer widths.
    """
    dims = [params[0][0].shape[1]] + [w.shape[0] for w, _ in params]
    dims_pad = [_round_up(d, _LANE) for d in dims]
    ws, bs = [], []
    for l, (w, b) in enumerate(params):
        kp, npd = dims_pad[l], dims_pad[l + 1]
        wt = (jnp.zeros((kp, npd), jnp.bfloat16)
              .at[: w.shape[1], : w.shape[0]].set(w.T.astype(jnp.bfloat16)))
        bp = (jnp.zeros((1, npd), jnp.float32)
              .at[0, : b.shape[0]].set(b.astype(jnp.float32)))
        ws.append(wt)
        bs.append(bp)
    return ws, bs, tuple(dims)


def _pick_tm(B):
    """Batch tile: >=8 sublanes; >=2 grid steps when B>16 (v7x megacore);
    capped at 256 rows to fill the 256-wide MXU on v6e/v7x with bounded VMEM."""
    if B <= 2 * _SUBLANE:
        return _round_up(B, _SUBLANE)
    return min(256, _round_up(-(-B // 2), _SUBLANE))


@functools.partial(jax.jit,
                   static_argnames=("n_class", "real_dims", "single_buffer_weights"))
def _mlp_forward_impl(x, ws, bs, *, n_class, real_dims, single_buffer_weights):
    # x: any shape with leading batch dim (e.g. NCHW); flatten like torch .view
    B = x.shape[0]
    h = x.reshape(B, -1).astype(jnp.float32)
    din = h.shape[1]
    din_pad = ws[0].shape[0]
    out_pad = ws[-1].shape[1]
    num_layers = len(ws)

    TM = _pick_tm(B)
    B_pad = _round_up(B, TM)
    x_pad = jnp.zeros((B_pad, din_pad), jnp.float32).at[:B, :din].set(h)

    # Constant-index weight/bias blocks are DMA'd once; single-buffer them so the
    # default 2-deep pipeline doesn't double their VMEM footprint.
    weight_pipeline = pl.Buffered(buffer_count=1) if single_buffer_weights else None

    in_specs = [pl.BlockSpec((TM, din_pad), lambda i: (i, 0))]
    args = [x_pad]
    wb_bytes = 0
    for w, b in zip(ws, bs):
        kp, npd = w.shape
        in_specs.append(pl.BlockSpec((kp, npd), lambda i: (0, 0),
                                     pipeline_mode=weight_pipeline))
        in_specs.append(pl.BlockSpec((1, npd), lambda i: (0, 0),
                                     pipeline_mode=weight_pipeline))
        args += [w, b]
        wb_bytes += w.size * w.dtype.itemsize + b.size * b.dtype.itemsize

    # Cost estimate from the REAL (unpadded) dims.
    flops = 0
    bytes_accessed = B * real_dims[0] * 4 + B * n_class * 4
    for d_in, d_out in zip(real_dims[:-1], real_dims[1:]):
        flops += 2 * B * d_in * d_out
        bytes_accessed += d_in * d_out * 2 + d_out * 4   # bf16 weights, f32 biases
    transcendentals = B * n_class + B                    # exp per class + log per row

    # Explicit VMEM budget from the actual footprint (+25% / +2 MiB headroom);
    # never below the 16 MiB scoped default, never above a safe 96 MiB.
    max_npad = max(w.shape[1] for w in ws)
    weight_copies = 1 if single_buffer_weights else 2
    vmem_bytes = (weight_copies * wb_bytes
                  + 2 * TM * din_pad * 4                 # double-buffered x tile
                  + 2 * TM * out_pad * 4                 # double-buffered out tile
                  + 2 * TM * max(max_npad, din_pad) * 4)  # activation temporaries
    vmem_limit = min(max(int(vmem_bytes * 1.25) + (2 << 20), 16 << 20), 96 << 20)

    kernel = functools.partial(_mlp_fused_kernel,
                               num_layers=num_layers, n_class=n_class)

    out = pl.pallas_call(
        kernel,
        out_shape=jax.ShapeDtypeStruct((B_pad, out_pad), jnp.float32),
        grid=(B_pad // TM,),
        in_specs=in_specs,
        out_specs=pl.BlockSpec((TM, out_pad), lambda i: (i, 0)),
        compiler_params=pltpu.CompilerParams(
            dimension_semantics=("parallel",),
            vmem_limit_bytes=vmem_limit),
        cost_estimate=pl.CostEstimate(
            flops=flops,
            transcendentals=transcendentals,
            bytes_accessed=bytes_accessed),
    )(*args)

    return out[:B, :n_class]


def mlp_forward(x, ws, bs, *, n_class, real_dims):
    """Public entry point.  Tries the single-buffered-weights path first and
    falls back to default double buffering if this jax build rejects it."""
    try:
        out = _mlp_forward_impl(x, ws, bs, n_class=n_class,
                                real_dims=tuple(real_dims),
                                single_buffer_weights=True)
        jax.block_until_ready(out)
        return out
    except Exception:
        # Fallback: identical kernel, default (2-deep) buffering on weights.
        return _mlp_forward_impl(x, ws, bs, n_class=n_class,
                                 real_dims=tuple(real_dims),
                                 single_buffer_weights=False)


# ------------------------------- Param init ----------------------------------

def init_mlp_params(key, input_dims, n_hiddens, n_class):
    """Deterministic init matching PyTorch Linear default (uniform +/- 1/sqrt(fan_in))."""
    if isinstance(n_hiddens, int):
        n_hiddens = [n_hiddens]
    dims = [input_dims] + list(n_hiddens) + [n_class]
    params = []
    for d_in, d_out in zip(dims[:-1], dims[1:]):
        key, kw, kb = jax.random.split(key, 3)
        bound = 1.0 / jnp.sqrt(d_in)
        w = jax.random.uniform(kw, (d_out, d_in), jnp.float32, -bound, bound)
        b = jax.random.uniform(kb, (d_out,), jnp.float32, -bound, bound)
        params.append((w, b))
    return params


# ------------------------------ Reference check ------------------------------

def mlp_forward_ref(x, params):
    B = x.shape[0]
    h = x.reshape(B, -1).astype(jnp.float32)
    for w, b in params[:-1]:
        h = jnp.maximum(h @ w.T + b, 0.0)
    w, b = params[-1]
    logits = h @ w.T + b
    return jax.nn.log_softmax(logits, axis=1)


if __name__ == "__main__":
    key = jax.random.PRNGKey(0)
    k_in, k_params = jax.random.split(key)

    # Small synthetic shapes: batch=2, 1-channel 16x16 "images" -> input_dims=256
    B, C, H, W = 2, 1, 16, 16
    input_dims = C * H * W          # 256
    n_hiddens = [32, 32]
    n_class = 10

    x = jax.random.normal(k_in, (B, C, H, W), jnp.float32)
    params = init_mlp_params(k_params, input_dims, n_hiddens, n_class)
    ws, bs, real_dims = prepare_params(params)   # transpose + pad + bf16 cast, once

    out = mlp_forward(x, ws, bs, n_class=n_class, real_dims=real_dims)
    jax.block_until_ready(out)

    ref = mlp_forward_ref(x, params)
    assert out.shape == (B, n_class)
    # bf16 MXU inputs with f32 accumulation vs pure-f32 reference -> relaxed tolerance.
    assert jnp.allclose(out, ref, atol=5e-2, rtol=5e-2), "mismatch vs reference"

    print("KERNEL_OK")
</pallas_src>

<mosaic_0001>
module attributes {stable_mosaic.version = 11 : i64} {
  func.func @_mlp_fused_kernel(%arg0: i32, %arg1: memref<8x256xf32, #tpu.memory_space<vmem>>, %arg2: memref<256x128xbf16, #tpu.memory_space<vmem>>, %arg3: memref<1x128xf32, #tpu.memory_space<vmem>>, %arg4: memref<128x128xbf16, #tpu.memory_space<vmem>>, %arg5: memref<1x128xf32, #tpu.memory_space<vmem>>, %arg6: memref<128x128xbf16, #tpu.memory_space<vmem>>, %arg7: memref<1x128xf32, #tpu.memory_space<vmem>>, %arg8: memref<8x128xf32, #tpu.memory_space<vmem>>) attributes {dimension_semantics = [#tpu.dimension_semantics<parallel>], iteration_bounds = array<i64: 1>, scalar_prefetch = 0 : i64, scratch_operands = 0 : i64, tpu.core_type = #tpu.core_type<tc>, window_params = [{transform_indices = @transform_0, window_bounds = array<i64: 8, 256>}, {pipeline_mode = #tpu.pipeline_mode<synchronous>, transform_indices = @transform_1, window_bounds = array<i64: 256, 128>}, {pipeline_mode = #tpu.pipeline_mode<synchronous>, transform_indices = @transform_2, window_bounds = array<i64: 1, 128>}, {pipeline_mode = #tpu.pipeline_mode<synchronous>, transform_indices = @transform_3, window_bounds = array<i64: 128, 128>}, {pipeline_mode = #tpu.pipeline_mode<synchronous>, transform_indices = @transform_4, window_bounds = array<i64: 1, 128>}, {pipeline_mode = #tpu.pipeline_mode<synchronous>, transform_indices = @transform_5, window_bounds = array<i64: 128, 128>}, {pipeline_mode = #tpu.pipeline_mode<synchronous>, transform_indices = @transform_6, window_bounds = array<i64: 1, 128>}, {transform_indices = @transform_7, window_bounds = array<i64: 8, 128>}]} {
    %c0 = arith.constant 0 : index
    %c0_0 = arith.constant 0 : index
    %0 = vector.load %arg1[%c0, %c0_0] : memref<8x256xf32, #tpu.memory_space<vmem>>, vector<8x256xf32>
    %c0_1 = arith.constant 0 : index
    %c0_2 = arith.constant 0 : index
    %1 = vector.load %arg2[%c0_1, %c0_2] : memref<256x128xbf16, #tpu.memory_space<vmem>>, vector<256x128xbf16>
    %c0_3 = arith.constant 0 : index
    %c0_4 = arith.constant 0 : index
    %2 = vector.load %arg3[%c0_3, %c0_4] : memref<1x128xf32, #tpu.memory_space<vmem>>, vector<1x128xf32>
    %3 = arith.truncf %0 : vector<8x256xf32> to vector<8x256xbf16>
    %cst = arith.constant dense<0.000000e+00> : vector<8x128xf32>
    %4 = tpu.matmul %3, %1, %cst {dimension_numbers = #tpu.dot_dimension_numbers<[1], [0], [0], [1], [0, 0, 1, 1], [], []>} : vector<8x256xbf16>, vector<256x128xbf16>, vector<8x128xf32> -> vector<8x128xf32>
    %5 = vector.broadcast %2 : vector<1x128xf32> to vector<8x128xf32>
    %6 = arith.addf %4, %5 : vector<8x128xf32>
    %cst_5 = arith.constant 0.000000e+00 : f32
    %7 = vector.broadcast %cst_5 : f32 to vector<8x128xf32>
    %8 = arith.maximumf %6, %7 : vector<8x128xf32>
    %c0_6 = arith.constant 0 : index
    %c0_7 = arith.constant 0 : index
    %9 = vector.load %arg4[%c0_6, %c0_7] : memref<128x128xbf16, #tpu.memory_space<vmem>>, vector<128x128xbf16>
    %c0_8 = arith.constant 0 : index
    %c0_9 = arith.constant 0 : index
    %10 = vector.load %arg5[%c0_8, %c0_9] : memref<1x128xf32, #tpu.memory_space<vmem>>, vector<1x128xf32>
    %11 = arith.truncf %8 : vector<8x128xf32> to vector<8x128xbf16>
    %cst_10 = arith.constant dense<0.000000e+00> : vector<8x128xf32>
    %12 = tpu.matmul %11, %9, %cst_10 {dimension_numbers = #tpu.dot_dimension_numbers<[1], [0], [0], [1], [0, 0, 1, 1], [], []>} : vector<8x128xbf16>, vector<128x128xbf16>, vector<8x128xf32> -> vector<8x128xf32>
    %13 = vector.broadcast %10 : vector<1x128xf32> to vector<8x128xf32>
    %14 = arith.addf %12, %13 : vector<8x128xf32>
    %cst_11 = arith.constant 0.000000e+00 : f32
    %15 = vector.broadcast %cst_11 : f32 to vector<8x128xf32>
    %16 = arith.maximumf %14, %15 : vector<8x128xf32>
    %c0_12 = arith.constant 0 : index
    %c0_13 = arith.constant 0 : index
    %17 = vector.load %arg6[%c0_12, %c0_13] : memref<128x128xbf16, #tpu.memory_space<vmem>>, vector<128x128xbf16>
    %c0_14 = arith.constant 0 : index
    %c0_15 = arith.constant 0 : index
    %18 = vector.load %arg7[%c0_14, %c0_15] : memref<1x128xf32, #tpu.memory_space<vmem>>, vector<1x128xf32>
    %19 = arith.truncf %16 : vector<8x128xf32> to vector<8x128xbf16>
    %cst_16 = arith.constant dense<0.000000e+00> : vector<8x128xf32>
    %20 = tpu.matmul %19, %17, %cst_16 {dimension_numbers = #tpu.dot_dimension_numbers<[1], [0], [0], [1], [0, 0, 1, 1], [], []>} : vector<8x128xbf16>, vector<128x128xbf16>, vector<8x128xf32> -> vector<8x128xf32>
    %21 = vector.broadcast %18 : vector<1x128xf32> to vector<8x128xf32>
    %22 = arith.addf %20, %21 : vector<8x128xf32>
    %23 = tpu.iota {dimensions = array<i32: 1>} : vector<8x128xi32>
    %c10_i32 = arith.constant 10 : i32
    %24 = vector.broadcast %c10_i32 : i32 to vector<8x128xi32>
    %25 = arith.cmpi slt, %23, %24 : vector<8x128xi32>
    %cst_17 = arith.constant -1.000000e+30 : f32
    %26 = vector.broadcast %cst_17 : f32 to vector<8x128xf32>
    %27 = arith.select %25, %22, %26 : vector<8x128xi1>, vector<8x128xf32>
    %cst_18 = arith.constant dense<0xFF800000> : vector<8xf32>
    %28 = vector.multi_reduction <maximumf>, %27, %cst_18 [1] : vector<8x128xf32> to vector<8xf32>
    %29 = vector.shape_cast %28 : vector<8xf32> to vector<8x1xf32>
    %30 = vector.broadcast %29 : vector<8x1xf32> to vector<8x128xf32>
    %31 = arith.subf %27, %30 : vector<8x128xf32>
    %32 = math.exp %31 : vector<8x128xf32>
    %cst_19 = arith.constant dense<0.000000e+00> : vector<8xf32>
    %33 = vector.multi_reduction <add>, %32, %cst_19 [1] : vector<8x128xf32> to vector<8xf32>
    %34 = vector.shape_cast %33 : vector<8xf32> to vector<8x1xf32>
    %35 = math.log %34 : vector<8x1xf32>
    %36 = vector.broadcast %35 : vector<8x1xf32> to vector<8x128xf32>
    %37 = arith.subf %31, %36 : vector<8x128xf32>
    %c0_20 = arith.constant 0 : index
    %c0_21 = arith.constant 0 : index
    %38 = vector.load %arg8[%c0_20, %c0_21] : memref<8x128xf32, #tpu.memory_space<vmem>>, vector<8x128xf32>
    tpu.vector_store %arg8[%c0_20, %c0_21], %37 {strides = array<i32>} : memref<8x128xf32, #tpu.memory_space<vmem>>, vector<8x128xf32>,
    return
  }
  func.func @transform_0(%arg0: i32) -> (i32, i32) {
    %c0_i32 = arith.constant 0 : i32
    %c0_i32_0 = arith.constant 0 : i32
    return %arg0, %c0_i32 : i32, i32
  }
  func.func @transform_1(%arg0: i32) -> (i32, i32) {
    %c0_i32 = arith.constant 0 : i32
    %c0_i32_0 = arith.constant 0 : i32
    %c0_i32_1 = arith.constant 0 : i32
    return %c0_i32, %c0_i32_0 : i32, i32
  }
  func.func @transform_2(%arg0: i32) -> (i32, i32) {
    %c0_i32 = arith.constant 0 : i32
    %c0_i32_0 = arith.constant 0 : i32
    %c0_i32_1 = arith.constant 0 : i32
    return %c0_i32, %c0_i32_0 : i32, i32
  }
  func.func @transform_3(%arg0: i32) -> (i32, i32) {
    %c0_i32 = arith.constant 0 : i32
    %c0_i32_0 = arith.constant 0 : i32
    %c0_i32_1 = arith.constant 0 : i32
    return %c0_i32, %c0_i32_0 : i32, i32
  }
  func.func @transform_4(%arg0: i32) -> (i32, i32) {
    %c0_i32 = arith.constant 0 : i32
    %c0_i32_0 = arith.constant 0 : i32
    %c0_i32_1 = arith.constant 0 : i32
    return %c0_i32, %c0_i32_0 : i32, i32
  }
  func.func @transform_5(%arg0: i32) -> (i32, i32) {
    %c0_i32 = arith.constant 0 : i32
    %c0_i32_0 = arith.constant 0 : i32
    %c0_i32_1 = arith.constant 0 : i32
    return %c0_i32, %c0_i32_0 : i32, i32
  }
  func.func @transform_6(%arg0: i32) -> (i32, i32) {
    %c0_i32 = arith.constant 0 : i32
    %c0_i32_0 = arith.constant 0 : i32
    %c0_i32_1 = arith.constant 0 : i32
    return %c0_i32, %c0_i32_0 : i32, i32
  }
  func.func @transform_7(%arg0: i32) -> (i32, i32) {
    %c0_i32 = arith.constant 0 : i32
    %c0_i32_0 = arith.constant 0 : i32
    return %arg0, %c0_i32 : i32, i32
  }
}

module attributes {stable_mosaic.version = 11 : i64} {
  func.func @_mlp_fused_kernel(%arg0: i32, %arg1: memref<8x256xf32, #tpu.memory_space<vmem>>, %arg2: memref<256x128xbf16, #tpu.memory_space<vmem>>, %arg3: memref<1x128xf32, #tpu.memory_space<vmem>>, %arg4: memref<128x128xbf16, #tpu.memory_space<vmem>>, %arg5: memref<1x128xf32, #tpu.memory_space<vmem>>, %arg6: memref<128x128xbf16, #tpu.memory_space<vmem>>, %arg7: memref<1x128xf32, #tpu.memory_space<vmem>>, %arg8: memref<8x128xf32, #tpu.memory_space<vmem>>) attributes {dimension_semantics = [#tpu.dimension_semantics<parallel>], iteration_bounds = array<i64: 1>, scalar_prefetch = 0 : i64, scratch_operands = 0 : i64, tpu.core_type = #tpu.core_type<tc>, window_params = [{transform_indices = @transform_0, window_bounds = array<i64: 8, 256>}, {pipeline_mode = #tpu.pipeline_mode<synchronous>, transform_indices = @transform_1, window_bounds = array<i64: 256, 128>}, {pipeline_mode = #tpu.pipeline_mode<synchronous>, transform_indices = @transform_2, window_bounds = array<i64: 1, 128>}, {pipeline_mode = #tpu.pipeline_mode<synchronous>, transform_indices = @transform_3, window_bounds = array<i64: 128, 128>}, {pipeline_mode = #tpu.pipeline_mode<synchronous>, transform_indices = @transform_4, window_bounds = array<i64: 1, 128>}, {pipeline_mode = #tpu.pipeline_mode<synchronous>, transform_indices = @transform_5, window_bounds = array<i64: 128, 128>}, {pipeline_mode = #tpu.pipeline_mode<synchronous>, transform_indices = @transform_6, window_bounds = array<i64: 1, 128>}, {transform_indices = @transform_7, window_bounds = array<i64: 8, 128>}]} {
    %c0 = arith.constant 0 : index
    %c0_0 = arith.constant 0 : index
    %0 = vector.load %arg1[%c0, %c0_0] : memref<8x256xf32, #tpu.memory_space<vmem>>, vector<8x256xf32>
    %c0_1 = arith.constant 0 : index
    %c0_2 = arith.constant 0 : index
    %1 = vector.load %arg2[%c0_1, %c0_2] : memref<256x128xbf16, #tpu.memory_space<vmem>>, vector<256x128xbf16>
    %c0_3 = arith.constant 0 : index
    %c0_4 = arith.constant 0 : index
    %2 = vector.load %arg3[%c0_3, %c0_4] : memref<1x128xf32, #tpu.memory_space<vmem>>, vector<1x128xf32>
    %3 = arith.truncf %0 : vector<8x256xf32> to vector<8x256xbf16>
    %cst = arith.constant dense<0.000000e+00> : vector<8x128xf32>
    %4 = tpu.matmul %3, %1, %cst {dimension_numbers = #tpu.dot_dimension_numbers<[1], [0], [0], [1], [0, 0, 1, 1], [], []>} : vector<8x256xbf16>, vector<256x128xbf16>, vector<8x128xf32> -> vector<8x128xf32>
    %5 = vector.broadcast %2 : vector<1x128xf32> to vector<8x128xf32>
    %6 = arith.addf %4, %5 : vector<8x128xf32>
    %cst_5 = arith.constant 0.000000e+00 : f32
    %7 = vector.broadcast %cst_5 : f32 to vector<8x128xf32>
    %8 = arith.maximumf %6, %7 : vector<8x128xf32>
    %c0_6 = arith.constant 0 : index
    %c0_7 = arith.constant 0 : index
    %9 = vector.load %arg4[%c0_6, %c0_7] : memref<128x128xbf16, #tpu.memory_space<vmem>>, vector<128x128xbf16>
    %c0_8 = arith.constant 0 : index
    %c0_9 = arith.constant 0 : index
    %10 = vector.load %arg5[%c0_8, %c0_9] : memref<1x128xf32, #tpu.memory_space<vmem>>, vector<1x128xf32>
    %11 = arith.truncf %8 : vector<8x128xf32> to vector<8x128xbf16>
    %cst_10 = arith.constant dense<0.000000e+00> : vector<8x128xf32>
    %12 = tpu.matmul %11, %9, %cst_10 {dimension_numbers = #tpu.dot_dimension_numbers<[1], [0], [0], [1], [0, 0, 1, 1], [], []>} : vector<8x128xbf16>, vector<128x128xbf16>, vector<8x128xf32> -> vector<8x128xf32>
    %13 = vector.broadcast %10 : vector<1x128xf32> to vector<8x128xf32>
    %14 = arith.addf %12, %13 : vector<8x128xf32>
    %cst_11 = arith.constant 0.000000e+00 : f32
    %15 = vector.broadcast %cst_11 : f32 to vector<8x128xf32>
    %16 = arith.maximumf %14, %15 : vector<8x128xf32>
    %c0_12 = arith.constant 0 : index
    %c0_13 = arith.constant 0 : index
    %17 = vector.load %arg6[%c0_12, %c0_13] : memref<128x128xbf16, #tpu.memory_space<vmem>>, vector<128x128xbf16>
    %c0_14 = arith.constant 0 : index
    %c0_15 = arith.constant 0 : index
    %18 = vector.load %arg7[%c0_14, %c0_15] : memref<1x128xf32, #tpu.memory_space<vmem>>, vector<1x128xf32>
    %19 = arith.truncf %16 : vector<8x128xf32> to vector<8x128xbf16>
    %cst_16 = arith.constant dense<0.000000e+00> : vector<8x128xf32>
    %20 = tpu.matmul %19, %17, %cst_16 {dimension_numbers = #tpu.dot_dimension_numbers<[1], [0], [0], [1], [0, 0, 1, 1], [], []>} : vector<8x128xbf16>, vector<128x128xbf16>, vector<8x128xf32> -> vector<8x128xf32>
    %21 = vector.broadcast %18 : vector<1x128xf32> to vector<8x128xf32>
    %22 = arith.addf %20, %21 : vector<8x128xf32>
    %23 = tpu.iota {dimensions = array<i32: 1>} : vector<8x128xi32>
    %c10_i32 = arith.constant 10 : i32
    %24 = vector.broadcast %c10_i32 : i32 to vector<8x128xi32>
    %25 = arith.cmpi slt, %23, %24 : vector<8x128xi32>
    %cst_17 = arith.constant -1.000000e+30 : f32
    %26 = vector.broadcast %cst_17 : f32 to vector<8x128xf32>
    %27 = arith.select %25, %22, %26 : vector<8x128xi1>, vector<8x128xf32>
    %cst_18 = arith.constant dense<0xFF800000> : vector<8xf32>
    %28 = vector.multi_reduction <maximumf>, %27, %cst_18 [1] : vector<8x128xf32> to vector<8xf32>
    %29 = vector.shape_cast %28 : vector<8xf32> to vector<8x1xf32>
    %30 = vector.broadcast %29 : vector<8x1xf32> to vector<8x128xf32>
    %31 = arith.subf %27, %30 : vector<8x128xf32>
    %32 = math.exp %31 : vector<8x128xf32>
    %cst_19 = arith.constant dense<0.000000e+00> : vector<8xf32>
    %33 = vector.multi_reduction <add>, %32, %cst_19 [1] : vector<8x128xf32> to vector<8xf32>
    %34 = vector.shape_cast %33 : vector<8xf32> to vector<8x1xf32>
    %35 = math.log %34 : vector<8x1xf32>
    %36 = vector.broadcast %35 : vector<8x1xf32> to vector<8x128xf32>
    %37 = arith.subf %31, %36 : vector<8x128xf32>
    %c0_20 = arith.constant 0 : index
    %c0_21 = arith.constant 0 : index
    %38 = vector.load %arg8[%c0_20, %c0_21] : memref<8x128xf32, #tpu.memory_space<vmem>>, vector<8x128xf32>
    tpu.vector_store %arg8[%c0_20, %c0_21], %37 {strides = array<i32>} : memref<8x128xf32, #tpu.memory_space<vmem>>, vector<8x128xf32>,
    return
  }
  func.func @transform_0(%arg0: i32) -> (i32, i32) {
    %c0_i32 = arith.constant 0 : i32
    %c0_i32_0 = arith.constant 0 : i32
    return %arg0, %c0_i32 : i32, i32
  }
  func.func @transform_1(%arg0: i32) -> (i32, i32) {
    %c0_i32 = arith.constant 0 : i32
    %c0_i32_0 = arith.constant 0 : i32
    %c0_i32_1 = arith.constant 0 : i32
    return %c0_i32, %c0_i32_0 : i32, i32
  }
  func.func @transform_2(%arg0: i32) -> (i32, i32) {
    %c0_i32 = arith.constant 0 : i32
    %c0_i32_0 = arith.constant 0 : i32
    %c0_i32_1 = arith.constant 0 : i32
    return %c0_i32, %c0_i32_0 : i32, i32
  }
  func.func @transform_3(%arg0: i32) -> (i32, i32) {
    %c0_i32 = arith.constant 0 : i32
    %c0_i32_0 = arith.constant 0 : i32
    %c0_i32_1 = arith.constant 0 : i32
    return %c0_i32, %c0_i32_0 : i32, i32
  }
  func.func @transform_4(%arg0: i32) -> (i32, i32) {
    %c0_i32 = arith.constant 0 : i32
    %c0_i32_0 = arith.constant 0 : i32
    %c0_i32_1 = arith.constant 0 : i32
    return %c0_i32, %c0_i32_0 : i32, i32
  }
  func.func @transform_5(%arg0: i32) -> (i32, i32) {
    %c0_i32 = arith.constant 0 : i32
    %c0_i32_0 = arith.constant 0 : i32
    %c0_i32_1 = arith.constant 0 : i32
    return %c0_i32, %c0_i32_0 : i32, i32
  }
  func.func @transform_6(%arg0: i32) -> (i32, i32) {
    %c0_i32 = arith.constant 0 : i32
    %c0_i32_0 = arith.constant 0 : i32
    %c0_i32_1 = arith.constant 0 : i32
    return %c0_i32, %c0_i32_0 : i32, i32
  }
  func.func @transform_7(%arg0: i32) -> (i32, i32) {
    %c0_i32 = arith.constant 0 : i32
    %c0_i32_0 = arith.constant 0 : i32
    return %arg0, %c0_i32 : i32, i32
  }
}

</mosaic_0001>

<bundles_post_ra>
// kernel: _mlp_forward_impl.1
= control target key start
LH: loop header
LB: loop body
LE: loop exit
PB: predicated region body
PF: predicated region fallthrough
CT: control target
= control target key end

     0   :  { %12 = vsyncpa [#allocation3], 0  ;;  %s808_s0 = inlined_call_operand.vmem [shape: f32[8,256], index: 0, kind: input, shape index: {}]   ;;  %s809_s1 = inlined_call_operand.hbm [shape: bf16[256,128], index: 1, kind: input, shape index: {}]   ;;  %s810_s2 = inlined_call_operand.vmem [shape: f32[1,128], index: 2, kind: input, shape index: {}]   ;;  %s811_s3 = inlined_call_operand.hbm [shape: bf16[128,128], index: 3, kind: input, shape index: {}]   ;;  %s812_s4 = inlined_call_operand.vmem [shape: f32[1,128], index: 4, kind: input, shape index: {}]   ;;  %s813_s5 = inlined_call_operand.hbm [shape: bf16[128,128], index: 5, kind: input, shape index: {}]   ;;  %s814_s6 = inlined_call_operand.vmem [shape: f32[1,128], index: 6, kind: input, shape index: {}]   ;;  %s815_s7 = inlined_call_operand.vmem [shape: f32[8,128], index: 7, kind: output, shape index: {}]  }
   0x1   :  { %13 = vsyncpa [#allocation5], 0  ;;  %s716_s24 = smov [#allocation4]   ;;  %s717_s26 = smov [#allocation2]  }
   0x2   :  { %s35_s25 = sshll.u32 %s716_s24, 4  ;;  %s21_s27 = sshll.u32 %s717_s26, 4  ;;  %s36_s25 = int_to_ptr.vmem [resolvable:$true] %s35_s25  ;;  %s22_s27 = int_to_ptr.vmem [resolvable:$true] %s21_s27 }
   0x3   :  { %s660_s28 = scalar_lea.vmem %s36_s25, 1024  ;;  %p665_p1 = scmp.lt.s32.totalorder %s36_s25, %s36_s25 }
   0x4   :  { %p661_p0 = scmp.ne.s32.totalorder %s36_s25, %s660_s28  ;;  %p666_p2 = scmp.lt.s32.totalorder %s660_s28, %s660_s28 }
   0x6   :  { %p667_p3 = por %p666_p2, %p665_p1 }
   0x8   :  { %p668_p4 = pnand %p667_p3, %p661_p0 }
   0xa   :  { %671 = shalt.err (!%p668_p4)
}
   0xb   :  { %s718_s29 = smov 64   ;;  %s719_s30 = smov 4  }
   0xc   :  { %41 = dma.hbm_to_vmem [thread:$0]  %s811_s3, 1024, %s36_s25, [#allocation5], %s718_s29, %s718_s29, %s719_s30  }
   0xd   :  { %s680_s10 = scalar_lea.vmem %s22_s27, 2048  ;;  %p685_p6 = scmp.lt.s32.totalorder %s22_s27, %s22_s27 }
   0xe   :  { %p681_p5 = scmp.ne.s32.totalorder %s22_s27, %s680_s10  ;;  %p686_p7 = scmp.lt.s32.totalorder %s680_s10, %s680_s10 }
  0x10   :  { %p687_p8 = por %p686_p7, %p685_p6 }
  0x12   :  { %p688_p9 = pnand %p687_p8, %p681_p5 }
  0x14   :  { %691 = shalt.err (!%p688_p9)
}
  0x15   :  { %27 = dma.hbm_to_vmem [thread:$0]  %s809_s1, 2048, %s22_s27, [#allocation3], %s718_s29, %s718_s29, %s719_s30  }
  0x16   :  { %s720_s13 = smov [#allocation6]  }
  0x17   :  { %s49_s14 = sshll.u32 %s720_s13, 4  ;;  %s50_s14 = int_to_ptr.vmem [resolvable:$true] %s49_s14 }
  0x18   :  { %s700_s15 = scalar_lea.vmem %s50_s14, 1024  ;;  %p705_p11 = scmp.lt.s32.totalorder %s50_s14, %s50_s14 }
  0x19   :  { %p701_p10 = scmp.ne.s32.totalorder %s50_s14, %s700_s15  ;;  %p706_p12 = scmp.lt.s32.totalorder %s700_s15, %s700_s15 }
  0x1b   :  { %p707_p13 = por %p706_p12, %p705_p11 }
  0x1d   :  { %p708_p0 = pnand %p707_p13, %p701_p10 }
  0x1f   :  { %711 = shalt.err (!%p708_p0)
}
  0x20   :  { %55 = dma.hbm_to_vmem [thread:$0]  %s813_s5, 1024, %s50_s14, [#allocation5], %s718_s29, %s718_s29, %s719_s30  }
  0x21   :  { %712 = dma.done.wait [#allocation3], 2048  }
  0x22   :  { %713 = vsyncadd [#allocation3], 4294965248 }
  0x23   :  { %714 = dma.done.wait [#allocation5], 2048  }
  0x24   :  { %715 = vsyncadd [#allocation5], 4294965248  ;;  %v721_v0 = vmov 0.0   ;;  %v616_v1 = vld [vmem:[#allocation2 + $0x78] sm:$0xff]   ;;  %v618_v3 = vld [vmem:[#allocation2 + $0x70] sm:$0xff]   ;;  %vm722_vm0 = vmmov 0   ;;  %v473_v54 = vlaneseq }
  0x25   :  { %569 = vmatprep.subr.bf16.mxu1 %v721_v0  ;;  %v617_v2 = vld [vmem:[#allocation2 + $0x38] sm:$0xff]   ;;  %529 = vmatprep.subr.bf16.mxu0 %v616_v1  ;;  %v619_v4 = vld [vmem:[#allocation2 + $0x30] sm:$0xff]   ;;  %v620_v5 = vld [vmem:[#allocation2 + $0x68] sm:$0xff]  }
  0x26   :  { %530 = vmatpush3.bf16.msra.mxu0 %v617_v2  ;;  %v621_v6 = vld [vmem:[#allocation2 + $0x28] sm:$0xff]   ;;  %v622_v7 = vld [vmem:[#allocation2 + $0x60] sm:$0xff]   ;;  %v624_v9 = vld [vmem:[#allocation2 + $0x58] sm:$0xff]   ;;  %585 = vmatprep.mubr.msk.bf16.mxu1 %vm722_vm0, %v721_v0  ;;  %v474_v55 = vand.u32 127, %v473_v54 }
  0x27   :  { %531 = vmatprep.subr.bf16.mxu0 %v618_v3  ;;  %v623_v8 = vld [vmem:[#allocation2 + $0x20] sm:$0xff]   ;;  %v625_v10 = vld [vmem:[#allocation2 + $0x18] sm:$0xff]   ;;  %v626_v11 = vld [vmem:[#allocation2 + $0x50] sm:$0xff]  }
  0x28   :  { %v69_v12 = vld [vmem:[%s808_s0 + $0x8] sm:$0xff]  ;;  %v632_v14 = vld [vmem:[#allocation4 + $0x38] sm:$0xff]   ;;  %v627_v15 = vld [vmem:[#allocation2 + $0x10] sm:$0xff]   ;;  %vm475_vm1 = vcmp.lt.s32.totalorder %v474_v55, 10 }
  0x29   :  { %v104_v13 = vpack.c.bf16 %v69_v12, %v69_v12  ;;  %v628_v16 = vld [vmem:[#allocation2 + $0x48] sm:$0xff]   ;;  %570 = vmatpush3.bf16.msra.mxu1 %v632_v14  ;;  %v633_v17 = vld [vmem:[#allocation4 + $0x30] sm:$0xff]   ;;  %v630_v19 = vld [vmem:[#allocation2 + $0x40] sm:$0xff]  }
  0x2a   :  { %532 = vmatpush3.bf16.msra.mxu0 %v619_v4  ;;  %v629_v18 = vld [vmem:[#allocation2 + $0x8] sm:$0xff]   ;;  %571 = vmatprep.subr.bf16.mxu1 %v721_v0  ;;  %v631_v21 = vld [vmem:[#allocation2] sm:$0xff]   ;;  %v636_v25 = vld [vmem:[#allocation4 + $0x18] sm:$0xff]  }
  0x2b   :  { %533 = vmatprep.subr.bf16.mxu0 %v620_v5  ;;  %239 = vmatprep.mubr.bf16.mxu0 %v104_v13  ;;  %v634_v20 = vld [vmem:[#allocation4 + $0x28] sm:$0xff]   ;;  %v68_v22 = vld [vmem:[%s808_s0] sm:$0xff]  ;;  %v637_v26 = vld [vmem:[#allocation4 + $0x10] sm:$0xff]  }
  0x2c   :  { %v635_v23 = vld [vmem:[#allocation4 + $0x20] sm:$0xff]   ;;  %v103_v24 = vpack.c.bf16 %v68_v22, %v68_v22  ;;  %v638_v27 = vld [vmem:[#allocation4 + $0x8] sm:$0xff]   ;;  %v640_v29 = vld [vmem:[#allocation6 + $0x38] sm:$0xff]  }
  0x2d   :  { %572 = vmatpush3.bf16.msra.mxu1 %v633_v17  ;;  %v639_v28 = vld [vmem:[#allocation4] sm:$0xff]   ;;  %v641_v30 = vld [vmem:[#allocation6 + $0x30] sm:$0xff]   ;;  %v642_v31 = vld [vmem:[#allocation6 + $0x28] sm:$0xff]  }
  0x2e   :  { %534 = vmatpush3.bf16.msra.mxu0 %v621_v6  ;;  %573 = vmatprep.subr.bf16.mxu1 %v721_v0  ;;  %v643_v32 = vld [vmem:[#allocation6 + $0x20] sm:$0xff]   ;;  %v644_v33 = vld [vmem:[#allocation6 + $0x18] sm:$0xff]   ;;  %v645_v34 = vld [vmem:[#allocation6 + $0x10] sm:$0xff]  }
  0x2f   :  { %535 = vmatprep.subr.bf16.mxu0 %v622_v7  ;;  %v494_v36 = vld [vmem:[%s810_s2] ss:$0 sm:$0xff]  ;;  %v646_v44 = vld [vmem:[#allocation6 + $0x8] sm:$0xff]  }
  0x30   :  { %v647_v45 = vld [vmem:[#allocation6] sm:$0xff]  }
  0x31   :  { %574 = vmatpush3.bf16.msra.mxu1 %v634_v20  ;;  %v511_v46 = vld [vmem:[%s812_s4] ss:$0 sm:$0xff] }
  0x32   :  { %536 = vmatpush3.bf16.msra.mxu0 %v623_v8  ;;  %575 = vmatprep.subr.bf16.mxu1 %v721_v0  ;;  %v520_v56 = vld [vmem:[%s814_s6] ss:$0 sm:$0xff] }
  0x33   :  { %537 = vmatprep.subr.bf16.mxu0 %v624_v9 }
  0x35   :  { %576 = vmatpush3.bf16.msra.mxu1 %v635_v23 }
  0x36   :  { %538 = vmatpush3.bf16.msra.mxu0 %v625_v10  ;;  %577 = vmatprep.subr.bf16.mxu1 %v721_v0 }
  0x37   :  { %539 = vmatprep.subr.bf16.mxu0 %v626_v11 }
  0x39   :  { %578 = vmatpush3.bf16.msra.mxu1 %v636_v25 }
  0x3a   :  { %540 = vmatpush3.bf16.msra.mxu0 %v627_v15  ;;  %579 = vmatprep.subr.bf16.mxu1 %v721_v0 }
  0x3b   :  { %541 = vmatprep.subr.bf16.mxu0 %v628_v16 }
  0x3d   :  { %580 = vmatpush3.bf16.msra.mxu1 %v637_v26 }
  0x3e   :  { %542 = vmatpush3.bf16.msra.mxu0 %v629_v18  ;;  %581 = vmatprep.subr.bf16.mxu1 %v721_v0 }
  0x3f   :  { %543 = vmatprep.subr.bf16.mxu0 %v630_v19 }
  0x41   :  { %582 = vmatpush3.bf16.msra.mxu1 %v638_v27 }
  0x42   :  { %544 = vmatpush3.bf16.msra.mxu0 %v631_v21  ;;  %583 = vmatprep.subr.bf16.mxu1 %v721_v0 }
  0x43   :  { %589 = vmatprep.subr.bf16.mxu0 %v721_v0 }
  0x45   :  { %240 = vmatmul.mubr.bf16.vlgmr.msra.gmra.mxu0 %v103_v24  ;;  %584 = vmatpush3.bf16.msra.mxu1 %v639_v28 }
  0x46   :  { %605 = vmatprep.mubr.msk.bf16.mxu0 %vm722_vm0, %v721_v0  ;;  %590 = vmatpush3.bf16.msra.mxu0 %v640_v29 }
  0x47   :  { %591 = vmatprep.subr.bf16.mxu0 %v721_v0 }
  0x4a   :  { %592 = vmatpush3.bf16.msra.mxu0 %v641_v30 }
  0x4b   :  { %593 = vmatprep.subr.bf16.mxu0 %v721_v0 }
  0x4e   :  { %594 = vmatpush3.bf16.msra.mxu0 %v642_v31 }
  0x4f   :  { %595 = vmatprep.subr.bf16.mxu0 %v721_v0 }
  0x52   :  { %596 = vmatpush3.bf16.msra.mxu0 %v643_v32 }
  0x53   :  { %597 = vmatprep.subr.bf16.mxu0 %v721_v0 }
  0x56   :  { %598 = vmatpush3.bf16.msra.mxu0 %v644_v33 }
  0x57   :  { %599 = vmatprep.subr.bf16.mxu0 %v721_v0 }
  0x5a   :  { %600 = vmatpush3.bf16.msra.mxu0 %v645_v34 }
  0x5b   :  { %601 = vmatprep.subr.bf16.mxu0 %v721_v0 }
  0x5e   :  { %602 = vmatpush3.bf16.msra.mxu0 %v646_v44 }
  0x5f   :  { %603 = vmatprep.subr.bf16.mxu0 %v721_v0 }
  0x62   :  { %604 = vmatpush3.bf16.msra.mxu0 %v647_v45 }
 0x105   :  { %v545_v35 = vpop.f32.mrf.mxu0 }
 0x107   :  { %v546_v37 = vpop.f32.mrf.mxu0 }
 0x108   :  { %v547_v38 = vadd.f32 %v546_v37, %v545_v35 }
 0x109   :  { %v548_v39 = vpop.f32.mrf.mxu0 }
 0x10a   :  { %v242_v40 = vadd.f32 %v547_v38, %v494_v36 }
 0x10b   :  { %v549_v41 = vpop.f32.mrf.mxu0 }
 0x10c   :  { %v247_v42 = vmax.f32 %v242_v40, 0.0 }
 0x10e   :  { %v265_v43 = vpack.c.bf16 %v247_v42, %v247_v42 }
 0x110   :  { %586 = vmatmul.mubr.bf16.vlgmr.msra.gmra.mxu1 %v265_v43 }
 0x1d0   :  { %v354_v47 = vpop.f32.mrf.mxu1 }
 0x1d1   :  { %v355_v48 = vadd.f32 %v511_v46, %v354_v47 }
 0x1d2   :  { %v587_v49 = vpop.f32.mrf.mxu1 }
 0x1d3   :  { %v360_v50 = vmax.f32 %v355_v48, 0.0 }
 0x1d4   :  { %v357_v51 = vpop.f32.mrf.mxu1 }
 0x1d5   :  { %v378_v52 = vpack.c.bf16 %v360_v50, %v360_v50 }
 0x1d6   :  { %v588_v53 = vpop.f32.mrf.mxu1 }
 0x1d7   :  { %606 = vmatmul.mubr.bf16.vlgmr.msra.gmra.mxu0 %v378_v52 }
 0x297   :  { %v467_v57 = vpop.f32.mrf.mxu0 }
 0x298   :  { %v468_v58 = vadd.f32 %v520_v56, %v467_v57 }
 0x299   :  { %v607_v59 = vpop.f32.mrf.mxu0 }
 0x29a   :  { %v476_v60 = vsel %vm475_vm1, %v468_v58, -1e+30 }
 0x29b   :  { %477 = vmax.xlane.f32.xlu0 %v476_v60  ;;  %v470_v61 = vpop.f32.mrf.mxu0 }
 0x29d   :  { %v608_v62 = vpop.f32.mrf.mxu0 }
 0x324   :  { %v478_v63 = vpop.xlane.xlu0 %477 }
 0x325   :  { %v479_v0 = vsub.f32 %v476_v60, %v478_v63 }
 0x327   :  { %v480_v1 = vmul.f32 1.442695, %v479_v0 }
 0x329   :  { %648 = vpow2.f32 %v480_v1 }
 0x336   :  { %v649_v2 = vpop.eup %648 }
 0x337   :  { %482 = vadd.xlane.f32.xlu0 %v649_v2 }
 0x3c0   :  { %v483_v3 = vpop.xlane.xlu0 %482 }
 0x3c1   :  { %650 = vlog2.f32 %v483_v3 }
 0x3ce   :  { %v651_v4 = vpop.eup %650 }
 0x3cf   :  { %v485_v5 = vmul.f32 0.6931472, %v651_v4 }
 0x3d1   :  { %v486_v6 = vsub.f32 %v479_v0, %v485_v5 }
 0x3d3   :  { %487 = vst [vmem:[%s815_s7] sm:$0xff] %v486_v6 }
 0x3d4   :  { %492 = vsyncpa [#allocation3], 1 }
 0x3d5   :  { %493 = vsyncpa [#allocation5], 1 }

// kernel: _mlp_forward_impl.1
= control target key start
LH: loop header
LB: loop body
LE: loop exit
PB: predicated region body
PF: predicated region fallthrough
CT: control target
= control target key end

     0   :  { %12 = vsyncpa [#allocation3], 0  ;;  %s808_s0 = inlined_call_operand.vmem [shape: f32[8,256], index: 0, kind: input, shape index: {}]   ;;  %s809_s1 = inlined_call_operand.hbm [shape: bf16[256,128], index: 1, kind: input, shape index: {}]   ;;  %s810_s2 = inlined_call_operand.vmem [shape: f32[1,128], index: 2, kind: input, shape index: {}]   ;;  %s811_s3 = inlined_call_operand.hbm [shape: bf16[128,128], index: 3, kind: input, shape index: {}]   ;;  %s812_s4 = inlined_call_operand.vmem [shape: f32[1,128], index: 4, kind: input, shape index: {}]   ;;  %s813_s5 = inlined_call_operand.hbm [shape: bf16[128,128], index: 5, kind: input, shape index: {}]   ;;  %s814_s6 = inlined_call_operand.vmem [shape: f32[1,128], index: 6, kind: input, shape index: {}]   ;;  %s815_s7 = inlined_call_operand.vmem [shape: f32[8,128], index: 7, kind: output, shape index: {}]  }
   0x1   :  { %13 = vsyncpa [#allocation5], 0  ;;  %s716_s24 = smov [#allocation4]   ;;  %s717_s26 = smov [#allocation2]  }
   0x2   :  { %s35_s25 = sshll.u32 %s716_s24, 4  ;;  %s21_s27 = sshll.u32 %s717_s26, 4  ;;  %s36_s25 = int_to_ptr.vmem [resolvable:$true] %s35_s25  ;;  %s22_s27 = int_to_ptr.vmem [resolvable:$true] %s21_s27 }
   0x3   :  { %s660_s28 = scalar_lea.vmem %s36_s25, 1024  ;;  %p665_p1 = scmp.lt.s32.totalorder %s36_s25, %s36_s25 }
   0x4   :  { %p661_p0 = scmp.ne.s32.totalorder %s36_s25, %s660_s28  ;;  %p666_p2 = scmp.lt.s32.totalorder %s660_s28, %s660_s28 }
   0x6   :  { %p667_p3 = por %p666_p2, %p665_p1 }
   0x8   :  { %p668_p4 = pnand %p667_p3, %p661_p0 }
   0xa   :  { %671 = shalt.err (!%p668_p4)
}
   0xb   :  { %s718_s29 = smov 64   ;;  %s719_s30 = smov 4  }
   0xc   :  { %41 = dma.hbm_to_vmem [thread:$0]  %s811_s3, 1024, %s36_s25, [#allocation5], %s718_s29, %s718_s29, %s719_s30  }
   0xd   :  { %s680_s10 = scalar_lea.vmem %s22_s27, 2048  ;;  %p685_p6 = scmp.lt.s32.totalorder %s22_s27, %s22_s27 }
   0xe   :  { %p681_p5 = scmp.ne.s32.totalorder %s22_s27, %s680_s10  ;;  %p686_p7 = scmp.lt.s32.totalorder %s680_s10, %s680_s10 }
  0x10   :  { %p687_p8 = por %p686_p7, %p685_p6 }
  0x12   :  { %p688_p9 = pnand %p687_p8, %p681_p5 }
  0x14   :  { %691 = shalt.err (!%p688_p9)
}
  0x15   :  { %27 = dma.hbm_to_vmem [thread:$0]  %s809_s1, 2048, %s22_s27, [#allocation3], %s718_s29, %s718_s29, %s719_s30  }
  0x16   :  { %s720_s13 = smov [#allocation6]  }
  0x17   :  { %s49_s14 = sshll.u32 %s720_s13, 4  ;;  %s50_s14 = int_to_ptr.vmem [resolvable:$true] %s49_s14 }
  0x18   :  { %s700_s15 = scalar_lea.vmem %s50_s14, 1024  ;;  %p705_p11 = scmp.lt.s32.totalorder %s50_s14, %s50_s14 }
  0x19   :  { %p701_p10 = scmp.ne.s32.totalorder %s50_s14, %s700_s15  ;;  %p706_p12 = scmp.lt.s32.totalorder %s700_s15, %s700_s15 }
  0x1b   :  { %p707_p13 = por %p706_p12, %p705_p11 }
  0x1d   :  { %p708_p0 = pnand %p707_p13, %p701_p10 }
  0x1f   :  { %711 = shalt.err (!%p708_p0)
}
  0x20   :  { %55 = dma.hbm_to_vmem [thread:$0]  %s813_s5, 1024, %s50_s14, [#allocation5], %s718_s29, %s718_s29, %s719_s30  }
  0x21   :  { %712 = dma.done.wait [#allocation3], 2048  }
  0x22   :  { %713 = vsyncadd [#allocation3], 4294965248 }
  0x23   :  { %714 = dma.done.wait [#allocation5], 2048  }
  0x24   :  { %715 = vsyncadd [#allocation5], 4294965248  ;;  %v721_v0 = vmov 0.0   ;;  %v616_v1 = vld [vmem:[#allocation2 + $0x78] sm:$0xff]   ;;  %v618_v3 = vld [vmem:[#allocation2 + $0x70] sm:$0xff]   ;;  %vm722_vm0 = vmmov 0   ;;  %v473_v54 = vlaneseq }
  0x25   :  { %569 = vmatprep.subr.bf16.mxu1 %v721_v0  ;;  %v617_v2 = vld [vmem:[#allocation2 + $0x38] sm:$0xff]   ;;  %529 = vmatprep.subr.bf16.mxu0 %v616_v1  ;;  %v619_v4 = vld [vmem:[#allocation2 + $0x30] sm:$0xff]   ;;  %v620_v5 = vld [vmem:[#allocation2 + $0x68] sm:$0xff]  }
  0x26   :  { %530 = vmatpush3.bf16.msra.mxu0 %v617_v2  ;;  %v621_v6 = vld [vmem:[#allocation2 + $0x28] sm:$0xff]   ;;  %v622_v7 = vld [vmem:[#allocation2 + $0x60] sm:$0xff]   ;;  %v624_v9 = vld [vmem:[#allocation2 + $0x58] sm:$0xff]   ;;  %585 = vmatprep.mubr.msk.bf16.mxu1 %vm722_vm0, %v721_v0  ;;  %v474_v55 = vand.u32 127, %v473_v54 }
  0x27   :  { %531 = vmatprep.subr.bf16.mxu0 %v618_v3  ;;  %v623_v8 = vld [vmem:[#allocation2 + $0x20] sm:$0xff]   ;;  %v625_v10 = vld [vmem:[#allocation2 + $0x18] sm:$0xff]   ;;  %v626_v11 = vld [vmem:[#allocation2 + $0x50] sm:$0xff]  }
  0x28   :  { %v69_v12 = vld [vmem:[%s808_s0 + $0x8] sm:$0xff]  ;;  %v632_v14 = vld [vmem:[#allocation4 + $0x38] sm:$0xff]   ;;  %v627_v15 = vld [vmem:[#allocation2 + $0x10] sm:$0xff]   ;;  %vm475_vm1 = vcmp.lt.s32.totalorder %v474_v55, 10 }
  0x29   :  { %v104_v13 = vpack.c.bf16 %v69_v12, %v69_v12  ;;  %v628_v16 = vld [vmem:[#allocation2 + $0x48] sm:$0xff]   ;;  %570 = vmatpush3.bf16.msra.mxu1 %v632_v14  ;;  %v633_v17 = vld [vmem:[#allocation4 + $0x30] sm:$0xff]   ;;  %v630_v19 = vld [vmem:[#allocation2 + $0x40] sm:$0xff]  }
  0x2a   :  { %532 = vmatpush3.bf16.msra.mxu0 %v619_v4  ;;  %v629_v18 = vld [vmem:[#allocation2 + $0x8] sm:$0xff]   ;;  %571 = vmatprep.subr.bf16.mxu1 %v721_v0  ;;  %v631_v21 = vld [vmem:[#allocation2] sm:$0xff]   ;;  %v636_v25 = vld [vmem:[#allocation4 + $0x18] sm:$0xff]  }
  0x2b   :  { %533 = vmatprep.subr.bf16.mxu0 %v620_v5  ;;  %239 = vmatprep.mubr.bf16.mxu0 %v104_v13  ;;  %v634_v20 = vld [vmem:[#allocation4 + $0x28] sm:$0xff]   ;;  %v68_v22 = vld [vmem:[%s808_s0] sm:$0xff]  ;;  %v637_v26 = vld [vmem:[#allocation4 + $0x10] sm:$0xff]  }
  0x2c   :  { %v635_v23 = vld [vmem:[#allocation4 + $0x20] sm:$0xff]   ;;  %v103_v24 = vpack.c.bf16 %v68_v22, %v68_v22  ;;  %v638_v27 = vld [vmem:[#allocation4 + $0x8] sm:$0xff]   ;;  %v640_v29 = vld [vmem:[#allocation6 + $0x38] sm:$0xff]  }
  0x2d   :  { %572 = vmatpush3.bf16.msra.mxu1 %v633_v17  ;;  %v639_v28 = vld [vmem:[#allocation4] sm:$0xff]   ;;  %v641_v30 = vld [vmem:[#allocation6 + $0x30] sm:$0xff]   ;;  %v642_v31 = vld [vmem:[#allocation6 + $0x28] sm:$0xff]  }
  0x2e   :  { %534 = vmatpush3.bf16.msra.mxu0 %v621_v6  ;;  %573 = vmatprep.subr.bf16.mxu1 %v721_v0  ;;  %v643_v32 = vld [vmem:[#allocation6 + $0x20] sm:$0xff]   ;;  %v644_v33 = vld [vmem:[#allocation6 + $0x18] sm:$0xff]   ;;  %v645_v34 = vld [vmem:[#allocation6 + $0x10] sm:$0xff]  }
  0x2f   :  { %535 = vmatprep.subr.bf16.mxu0 %v622_v7  ;;  %v494_v36 = vld [vmem:[%s810_s2] ss:$0 sm:$0xff]  ;;  %v646_v44 = vld [vmem:[#allocation6 + $0x8] sm:$0xff]  }
  0x30   :  { %v647_v45 = vld [vmem:[#allocation6] sm:$0xff]  }
  0x31   :  { %574 = vmatpush3.bf16.msra.mxu1 %v634_v20  ;;  %v511_v46 = vld [vmem:[%s812_s4] ss:$0 sm:$0xff] }
  0x32   :  { %536 = vmatpush3.bf16.msra.mxu0 %v623_v8  ;;  %575 = vmatprep.subr.bf16.mxu1 %v721_v0  ;;  %v520_v56 = vld [vmem:[%s814_s6] ss:$0 sm:$0xff] }
  0x33   :  { %537 = vmatprep.subr.bf16.mxu0 %v624_v9 }
  0x35   :  { %576 = vmatpush3.bf16.msra.mxu1 %v635_v23 }
  0x36   :  { %538 = vmatpush3.bf16.msra.mxu0 %v625_v10  ;;  %577 = vmatprep.subr.bf16.mxu1 %v721_v0 }
  0x37   :  { %539 = vmatprep.subr.bf16.mxu0 %v626_v11 }
  0x39   :  { %578 = vmatpush3.bf16.msra.mxu1 %v636_v25 }
  0x3a   :  { %540 = vmatpush3.bf16.msra.mxu0 %v627_v15  ;;  %579 = vmatprep.subr.bf16.mxu1 %v721_v0 }
  0x3b   :  { %541 = vmatprep.subr.bf16.mxu0 %v628_v16 }
  0x3d   :  { %580 = vmatpush3.bf16.msra.mxu1 %v637_v26 }
  0x3e   :  { %542 = vmatpush3.bf16.msra.mxu0 %v629_v18  ;;  %581 = vmatprep.subr.bf16.mxu1 %v721_v0 }
  0x3f   :  { %543 = vmatprep.subr.bf16.mxu0 %v630_v19 }
  0x41   :  { %582 = vmatpush3.bf16.msra.mxu1 %v638_v27 }
  0x42   :  { %544 = vmatpush3.bf16.msra.mxu0 %v631_v21  ;;  %583 = vmatprep.subr.bf16.mxu1 %v721_v0 }
  0x43   :  { %589 = vmatprep.subr.bf16.mxu0 %v721_v0 }
  0x45   :  { %240 = vmatmul.mubr.bf16.vlgmr.msra.gmra.mxu0 %v103_v24  ;;  %584 = vmatpush3.bf16.msra.mxu1 %v639_v28 }
  0x46   :  { %605 = vmatprep.mubr.msk.bf16.mxu0 %vm722_vm0, %v721_v0  ;;  %590 = vmatpush3.bf16.msra.mxu0 %v640_v29 }
  0x47   :  { %591 = vmatprep.subr.bf16.mxu0 %v721_v0 }
  0x4a   :  { %592 = vmatpush3.bf16.msra.mxu0 %v641_v30 }
  0x4b   :  { %593 = vmatprep.subr.bf16.mxu0 %v721_v0 }
  0x4e   :  { %594 = vmatpush3.bf16.msra.mxu0 %v642_v31 }
  0x4f   :  { %595 = vmatprep.subr.bf16.mxu0 %v721_v0 }
  0x52   :  { %596 = vmatpush3.bf16.msra.mxu0 %v643_v32 }
  0x53   :  { %597 = vmatprep.subr.bf16.mxu0 %v721_v0 }
  0x56   :  { %598 = vmatpush3.bf16.msra.mxu0 %v644_v33 }
  0x57   :  { %599 = vmatprep.subr.bf16.mxu0 %v721_v0 }
  0x5a   :  { %600 = vmatpush3.bf16.msra.mxu0 %v645_v34 }
  0x5b   :  { %601 = vmatprep.subr.bf16.mxu0 %v721_v0 }
  0x5e   :  { %602 = vmatpush3.bf16.msra.mxu0 %v646_v44 }
  0x5f   :  { %603 = vmatprep.subr.bf16.mxu0 %v721_v0 }
  0x62   :  { %604 = vmatpush3.bf16.msra.mxu0 %v647_v45 }
 0x105   :  { %v545_v35 = vpop.f32.mrf.mxu0 }
 0x107   :  { %v546_v37 = vpop.f32.mrf.mxu0 }
 0x108   :  { %v547_v38 = vadd.f32 %v546_v37, %v545_v35 }
 0x109   :  { %v548_v39 = vpop.f32.mrf.mxu0 }
 0x10a   :  { %v242_v40 = vadd.f32 %v547_v38, %v494_v36 }
 0x10b   :  { %v549_v41 = vpop.f32.mrf.mxu0 }
 0x10c   :  { %v247_v42 = vmax.f32 %v242_v40, 0.0 }
 0x10e   :  { %v265_v43 = vpack.c.bf16 %v247_v42, %v247_v42 }
 0x110   :  { %586 = vmatmul.mubr.bf16.vlgmr.msra.gmra.mxu1 %v265_v43 }
 0x1d0   :  { %v354_v47 = vpop.f32.mrf.mxu1 }
 0x1d1   :  { %v355_v48 = vadd.f32 %v511_v46, %v354_v47 }
 0x1d2   :  { %v587_v49 = vpop.f32.mrf.mxu1 }
 0x1d3   :  { %v360_v50 = vmax.f32 %v355_v48, 0.0 }
 0x1d4   :  { %v357_v51 = vpop.f32.mrf.mxu1 }
 0x1d5   :  { %v378_v52 = vpack.c.bf16 %v360_v50, %v360_v50 }
 0x1d6   :  { %v588_v53 = vpop.f32.mrf.mxu1 }
 0x1d7   :  { %606 = vmatmul.mubr.bf16.vlgmr.msra.gmra.mxu0 %v378_v52 }
 0x297   :  { %v467_v57 = vpop.f32.mrf.mxu0 }
 0x298   :  { %v468_v58 = vadd.f32 %v520_v56, %v467_v57 }
 0x299   :  { %v607_v59 = vpop.f32.mrf.mxu0 }
 0x29a   :  { %v476_v60 = vsel %vm475_vm1, %v468_v58, -1e+30 }
 0x29b   :  { %477 = vmax.xlane.f32.xlu0 %v476_v60  ;;  %v470_v61 = vpop.f32.mrf.mxu0 }
 0x29d   :  { %v608_v62 = vpop.f32.mrf.mxu0 }
 0x324   :  { %v478_v63 = vpop.xlane.xlu0 %477 }
 0x325   :  { %v479_v0 = vsub.f32 %v476_v60, %v478_v63 }
 0x327   :  { %v480_v1 = vmul.f32 1.442695, %v479_v0 }
 0x329   :  { %648 = vpow2.f32 %v480_v1 }
 0x336   :  { %v649_v2 = vpop.eup %648 }
 0x337   :  { %482 = vadd.xlane.f32.xlu0 %v649_v2 }
 0x3c0   :  { %v483_v3 = vpop.xlane.xlu0 %482 }
 0x3c1   :  { %650 = vlog2.f32 %v483_v3 }
 0x3ce   :  { %v651_v4 = vpop.eup %650 }
 0x3cf   :  { %v485_v5 = vmul.f32 0.6931472, %v651_v4 }
 0x3d1   :  { %v486_v6 = vsub.f32 %v479_v0, %v485_v5 }
 0x3d3   :  { %487 = vst [vmem:[%s815_s7] sm:$0xff] %v486_v6 }
 0x3d4   :  { %492 = vsyncpa [#allocation3], 1 }
 0x3d5   :  { %493 = vsyncpa [#allocation5], 1 }

</bundles_post_ra>
